<compile_context>
chip_gen: v7x
topology: tpu7x:2x2x1
jax: 0.10.0
libtpu: 0.0.40
codegen_flags: <defaults>
</compile_context>

<pallas_src>
import functools
import math

import jax
import jax.numpy as jnp
import numpy as np
from jax.experimental import pallas as pl
from jax.experimental.pallas import tpu as pltpu


def _dbm_kernel(logits_ref, target_ref, margin_ref, out_ref, *,
                scale, lambda_inst):
    # logits_ref: (TB, C) in native dtype, target_ref: (TB, 1) int32,
    # margin_ref: (1, C) f32, out_ref: (TB, C).
    cosine = logits_ref[...]                                  # (TB, C), native dtype
    tgt = target_ref[...]                                     # (TB, 1) int32
    mrg = margin_ref[...]                                     # (1, C) f32

    TB, C = cosine.shape
    col = jax.lax.broadcasted_iota(jnp.int32, (TB, C), 1)     # class index per lane
    is_tgt = (col == tgt)                                     # (TB, C) one-hot mask

    # Per-row target cosine / per-row class margin (exact one-hot sums, XLU).
    # Only the (TB, 1) scalars are promoted to f32 for the trig path.
    cos_t = jnp.sum(jnp.where(is_tgt, cosine, 0.0),
                    axis=-1, keepdims=True).astype(jnp.float32)          # (TB, 1)
    m_base = jnp.sum(jnp.where(is_tgt, mrg, 0.0),
                     axis=-1, keepdims=True)                             # (TB, 1) f32

    # incorrect = argmax(logits, -1) != target  (first-maximal index, torch tie rule)
    row_max = jnp.max(cosine, axis=-1, keepdims=True)
    pred = jnp.min(jnp.where(cosine == row_max, col, C), axis=-1, keepdims=True)
    incorrect = (pred != tgt).astype(jnp.float32)                        # (TB, 1)

    # margin_cls + lambda * margin_cls * (1-cos)/2 * incorrect, only at target lane.
    m_row = m_base * (1.0 + lambda_inst * incorrect * (1.0 - cos_t) * 0.5)

    # scale * cos(acos(x) + m) == scale * (x*cos(m) - sqrt(1-x^2)*sin(m)) for |x|<=1.
    # sqrt((1-x)*(1+x)) avoids cancellation near |x| -> 1.
    sin_t = jnp.sqrt(jnp.maximum((1.0 - cos_t) * (1.0 + cos_t), 0.0))
    corrected = scale * (cos_t * jnp.cos(m_row) - sin_t * jnp.sin(m_row))  # (TB,1) f32

    # Non-target lanes: margin == 0  =>  output is just scale * cosine (native dtype,
    # no full-tile f32 materialization for bf16 inputs).
    out = jnp.where(is_tgt, corrected.astype(cosine.dtype), scale * cosine)
    out_ref[...] = out.astype(out_ref.dtype)


class DBMarginPallas:
    """JAX/Pallas port of cifar/losses/dbm.py::DBMargin (forward pass)."""

    def __init__(self, dist, *, cos_scale, use_dbm, tau, max_margin, lambda_inst):
        dist = jnp.asarray(np.array(dist), dtype=jnp.float32)
        self.n_classes = dist.shape[0]
        self.scale = float(cos_scale)
        self.use_dbm = bool(use_dbm)
        prob = dist / jnp.sum(dist)
        inv = 1.0 / prob ** tau
        # margin shape (1, n_classes), float32, same as the PyTorch buffer
        self.margin = (inv / inv[-1])[None, :] * max_margin
        self.lambda_inst = float(lambda_inst)

    def __call__(self, logits, target, *, block_rows=1024,
                 vmem_budget_bytes=12 << 20):
        if not self.use_dbm:
            return self.scale * logits

        B, C = logits.shape
        out_dtype = logits.dtype
        in_bytes = jnp.dtype(logits.dtype).itemsize
        out_bytes = jnp.dtype(out_dtype).itemsize

        # Batch tile: as large as possible while double-buffered (in + out) blocks
        # stay inside a conservative VMEM budget (fits v5e 16 MiB scoped default,
        # v6e/v7x 32 MiB scoped default, v7x 64 MiB physical).
        bytes_per_row = max(1, C * (in_bytes + out_bytes))
        max_tb_vmem = max(8, vmem_budget_bytes // (2 * bytes_per_row))
        TB = min(int(block_rows), int(max_tb_vmem))
        if TB >= B:
            TB = B                        # block == full batch dim (exempt from 8-rule)
        else:
            TB = max(8, (TB // 8) * 8)    # multiple of 8 sublanes; ragged last block
                                          # handled by Pallas masked writeback.
        grid = (pl.cdiv(B, TB),)

        target2d = target.astype(jnp.int32).reshape(B, 1)
        margin_f32 = self.margin.astype(jnp.float32)          # (1, C), stays f32

        kernel = functools.partial(
            _dbm_kernel, scale=self.scale, lambda_inst=self.lambda_inst)

        cost = pl.CostEstimate(
            flops=10 * B * C,
            transcendentals=2 * B,                 # per-row cos + sin
            bytes_accessed=B * C * (in_bytes + out_bytes) + B * 4 + C * 4,
        )

        out = pl.pallas_call(
            kernel,
            out_shape=jax.ShapeDtypeStruct((B, C), out_dtype),
            grid=grid,
            in_specs=[
                pl.BlockSpec((TB, C), lambda i: (i, 0)),   # logits tile
                pl.BlockSpec((TB, 1), lambda i: (i, 0)),   # targets
                pl.BlockSpec((1, C), lambda i: (0, 0)),    # margin (resident)
            ],
            out_specs=pl.BlockSpec((TB, C), lambda i: (i, 0)),
            compiler_params=pltpu.CompilerParams(
                dimension_semantics=("parallel",)),
            cost_estimate=cost,
        )(logits, target2d, margin_f32)

        return out


def _reference(logits, target, margin, scale, lambda_inst, n_classes):
    # Pure-JAX re-implementation of the PyTorch forward (use_dbm=True).
    logits = logits.astype(jnp.float32)
    target_oh = jax.nn.one_hot(target, n_classes, dtype=jnp.float32)
    incorrect = (jnp.argmax(logits, axis=-1) != target)
    margin_cls = margin * target_oh
    cosine = logits
    inst_diff = (1.0 - cosine) / 2.0
    margin_inst = margin_cls * inst_diff * incorrect[:, None]
    m = margin_cls + lambda_inst * margin_inst
    return scale * jnp.cos(jnp.arccos(cosine) + m)


def _check(module, B, C, key, block_rows):
    k1, k2 = jax.random.split(key)
    # logits are cosine similarities, keep them strictly inside (-1, 1)
    logits = jnp.tanh(jax.random.normal(k1, (B, C), dtype=jnp.float32))
    target = jax.random.randint(k2, (B,), 0, C, dtype=jnp.int32)

    out = module(logits, target, block_rows=block_rows)
    out = jax.block_until_ready(out)

    ref = _reference(logits, target, module.margin.astype(jnp.float32),
                     module.scale, module.lambda_inst, C)
    if not np.allclose(np.asarray(out), np.asarray(ref), rtol=1e-4, atol=1e-4):
        raise AssertionError("Pallas DBMargin output does not match reference")


if __name__ == "__main__":
    C = 16  # n_classes

    # Deterministic long-tailed class distribution (like a CIFAR-LT class-count list).
    dist = [float(max(1, int(100.0 * math.exp(-0.3 * i)))) for i in range(C)]

    module = DBMarginPallas(
        dist,
        cos_scale=30.0,
        use_dbm=True,
        tau=1.0,
        max_margin=0.5,
        lambda_inst=0.5,
    )

    key = jax.random.PRNGKey(0)
    k1, k2 = jax.random.split(key)

    # Single-block case (TB == B, full-dim block).
    _check(module, B=8, C=C, key=k1, block_rows=1024)
    # Multi-block + ragged final block case (B=20, TB=8 -> grid=3, last block 4 rows).
    _check(module, B=20, C=C, key=k2, block_rows=8)

    print("KERNEL_OK")
</pallas_src>

<mosaic_0001>
module attributes {stable_mosaic.version = 11 : i64} {
  func.func @_dbm_kernel(%arg0: i32, %arg1: memref<8x16xf32, #tpu.memory_space<vmem>>, %arg2: memref<8x1xi32, #tpu.memory_space<vmem>>, %arg3: memref<1x16xf32, #tpu.memory_space<vmem>>, %arg4: memref<8x16xf32, #tpu.memory_space<vmem>>) attributes {dimension_semantics = [#tpu.dimension_semantics<parallel>], iteration_bounds = array<i64: 1>, scalar_prefetch = 0 : i64, scratch_operands = 0 : i64, tpu.core_type = #tpu.core_type<tc>, window_params = [{transform_indices = @transform_0, window_bounds = array<i64: 8, 16>}, {transform_indices = @transform_1, window_bounds = array<i64: 8, 1>}, {pipeline_mode = #tpu.pipeline_mode<synchronous>, transform_indices = @transform_2, window_bounds = array<i64: 1, 16>}, {transform_indices = @transform_3, window_bounds = array<i64: 8, 16>}]} {
    %c0 = arith.constant 0 : index
    %c0_0 = arith.constant 0 : index
    %0 = vector.load %arg1[%c0, %c0_0] : memref<8x16xf32, #tpu.memory_space<vmem>>, vector<8x16xf32>
    %c0_1 = arith.constant 0 : index
    %c0_2 = arith.constant 0 : index
    %1 = vector.load %arg2[%c0_1, %c0_2] : memref<8x1xi32, #tpu.memory_space<vmem>>, vector<8x1xi32>
    %c0_3 = arith.constant 0 : index
    %c0_4 = arith.constant 0 : index
    %2 = vector.load %arg3[%c0_3, %c0_4] : memref<1x16xf32, #tpu.memory_space<vmem>>, vector<1x16xf32>
    %3 = tpu.iota {dimensions = array<i32: 1>} : vector<8x16xi32>
    %4 = vector.broadcast %1 : vector<8x1xi32> to vector<8x16xi32>
    %5 = arith.cmpi eq, %3, %4 : vector<8x16xi32>
    %cst = arith.constant 0.000000e+00 : f32
    %6 = vector.broadcast %cst : f32 to vector<8x16xf32>
    %7 = arith.select %5, %0, %6 : vector<8x16xi1>, vector<8x16xf32>
    %cst_5 = arith.constant dense<0.000000e+00> : vector<8xf32>
    %8 = vector.multi_reduction <add>, %7, %cst_5 [1] : vector<8x16xf32> to vector<8xf32>
    %9 = vector.shape_cast %8 : vector<8xf32> to vector<8x1xf32>
    %cst_6 = arith.constant 0.000000e+00 : f32
    %10 = vector.shape_cast %2 : vector<1x16xf32> to vector<1x16xf32>
    %11 = vector.broadcast %10 : vector<1x16xf32> to vector<8x16xf32>
    %12 = vector.broadcast %cst_6 : f32 to vector<8x16xf32>
    %13 = arith.select %5, %11, %12 : vector<8x16xi1>, vector<8x16xf32>
    %cst_7 = arith.constant dense<0.000000e+00> : vector<8xf32>
    %14 = vector.multi_reduction <add>, %13, %cst_7 [1] : vector<8x16xf32> to vector<8xf32>
    %15 = vector.shape_cast %14 : vector<8xf32> to vector<8x1xf32>
    %cst_8 = arith.constant dense<0xFF800000> : vector<8xf32>
    %16 = vector.multi_reduction <maximumf>, %0, %cst_8 [1] : vector<8x16xf32> to vector<8xf32>
    %17 = vector.shape_cast %16 : vector<8xf32> to vector<8x1xf32>
    %18 = vector.broadcast %17 : vector<8x1xf32> to vector<8x16xf32>
    %19 = arith.cmpf oeq, %0, %18 : vector<8x16xf32>
    %c16_i32 = arith.constant 16 : i32
    %20 = vector.broadcast %c16_i32 : i32 to vector<8x16xi32>
    %21 = arith.select %19, %3, %20 : vector<8x16xi1>, vector<8x16xi32>
    %cst_9 = arith.constant dense<2147483647> : vector<8xi32>
    %22 = vector.multi_reduction <minsi>, %21, %cst_9 [1] : vector<8x16xi32> to vector<8xi32>
    %23 = vector.shape_cast %22 : vector<8xi32> to vector<8x1xi32>
    %24 = arith.cmpi ne, %23, %1 : vector<8x1xi32>
    %25 = arith.extui %24 : vector<8x1xi1> to vector<8x1xi32>
    %26 = arith.sitofp %25 : vector<8x1xi32> to vector<8x1xf32>
    %cst_10 = arith.constant 5.000000e-01 : f32
    %27 = vector.broadcast %cst_10 : f32 to vector<8x1xf32>
    %28 = arith.mulf %27, %26 : vector<8x1xf32>
    %cst_11 = arith.constant 1.000000e+00 : f32
    %29 = vector.broadcast %cst_11 : f32 to vector<8x1xf32>
    %30 = arith.subf %29, %9 : vector<8x1xf32>
    %31 = arith.mulf %28, %30 : vector<8x1xf32>
    %cst_12 = arith.constant 5.000000e-01 : f32
    %32 = vector.broadcast %cst_12 : f32 to vector<8x1xf32>
    %33 = arith.mulf %31, %32 : vector<8x1xf32>
    %cst_13 = arith.constant 1.000000e+00 : f32
    %34 = vector.broadcast %cst_13 : f32 to vector<8x1xf32>
    %35 = arith.addf %34, %33 : vector<8x1xf32>
    %36 = arith.mulf %15, %35 : vector<8x1xf32>
    %cst_14 = arith.constant 1.000000e+00 : f32
    %37 = vector.broadcast %cst_14 : f32 to vector<8x1xf32>
    %38 = arith.subf %37, %9 : vector<8x1xf32>
    %cst_15 = arith.constant 1.000000e+00 : f32
    %39 = vector.broadcast %cst_15 : f32 to vector<8x1xf32>
    %40 = arith.addf %39, %9 : vector<8x1xf32>
    %41 = arith.mulf %38, %40 : vector<8x1xf32>
    %cst_16 = arith.constant 0.000000e+00 : f32
    %42 = vector.broadcast %cst_16 : f32 to vector<8x1xf32>
    %43 = arith.maximumf %41, %42 : vector<8x1xf32>
    %44 = math.sqrt %43 : vector<8x1xf32>
    %45 = math.cos %36 : vector<8x1xf32>
    %46 = arith.mulf %9, %45 : vector<8x1xf32>
    %47 = math.sin %36 : vector<8x1xf32>
    %48 = arith.mulf %44, %47 : vector<8x1xf32>
    %49 = arith.subf %46, %48 : vector<8x1xf32>
    %cst_17 = arith.constant 3.000000e+01 : f32
    %50 = vector.broadcast %cst_17 : f32 to vector<8x1xf32>
    %51 = arith.mulf %50, %49 : vector<8x1xf32>
    %cst_18 = arith.constant 3.000000e+01 : f32
    %52 = vector.broadcast %cst_18 : f32 to vector<8x16xf32>
    %53 = arith.mulf %52, %0 : vector<8x16xf32>
    %54 = vector.shape_cast %51 : vector<8x1xf32> to vector<8x1xf32>
    %55 = vector.broadcast %54 : vector<8x1xf32> to vector<8x16xf32>
    %56 = arith.select %5, %55, %53 : vector<8x16xi1>, vector<8x16xf32>
    %c0_19 = arith.constant 0 : index
    %c0_20 = arith.constant 0 : index
    %57 = vector.load %arg4[%c0_19, %c0_20] : memref<8x16xf32, #tpu.memory_space<vmem>>, vector<8x16xf32>
    tpu.vector_store %arg4[%c0_19, %c0_20], %56 {strides = array<i32>} : memref<8x16xf32, #tpu.memory_space<vmem>>, vector<8x16xf32>,
    return
  }
  func.func @transform_0(%arg0: i32) -> (i32, i32) {
    %c0_i32 = arith.constant 0 : i32
    %c0_i32_0 = arith.constant 0 : i32
    return %arg0, %c0_i32 : i32, i32
  }
  func.func @transform_1(%arg0: i32) -> (i32, i32) {
    %c0_i32 = arith.constant 0 : i32
    %c0_i32_0 = arith.constant 0 : i32
    return %arg0, %c0_i32 : i32, i32
  }
  func.func @transform_2(%arg0: i32) -> (i32, i32) {
    %c0_i32 = arith.constant 0 : i32
    %c0_i32_0 = arith.constant 0 : i32
    %c0_i32_1 = arith.constant 0 : i32
    return %c0_i32, %c0_i32_0 : i32, i32
  }
  func.func @transform_3(%arg0: i32) -> (i32, i32) {
    %c0_i32 = arith.constant 0 : i32
    %c0_i32_0 = arith.constant 0 : i32
    return %arg0, %c0_i32 : i32, i32
  }
}

</mosaic_0001>

<bundles_post_ra>
// kernel: tpu_custom_call.1
= control target key start
LH: loop header
LB: loop body
LE: loop exit
PB: predicated region body
PF: predicated region fallthrough
CT: control target
= control target key end

     0   :  { %vm25_vm0 = vcmask 130048   ;;  %s473_s0 = inlined_call_operand.vmem [shape: f32[8,16], index: 0, kind: input, shape index: {}]   ;;  %s474_s1 = inlined_call_operand.vmem [shape: s32[8,1], index: 1, kind: input, shape index: {}]   ;;  %s475_s2 = inlined_call_operand.vmem [shape: f32[1,16], index: 2, kind: input, shape index: {}]   ;;  %s476_s3 = inlined_call_operand.hbm [shape: f32[8,16], index: 3, kind: output, shape index: {}]  }
   0x1   :  { %v398_v0 = vld [vmem:[%s473_s0] sm:$0xff] }
   0x2   :  { %8 = vsyncpa [#allocation3], 0  ;;  %v39_v1 = vsel %vm25_vm0, %v398_v0, -inf  ;;  %v16_v2 = vld [vmem:[%s474_s1] sm:$0xff]  ;;  %v366_v3 = vmov 0   ;;  %v18_v4 = vlaneseq  ;;  %v367_v27 = vmov 0.0  }
   0x3   :  { %40 = vmax.xlane.f32.xlu0 %v39_v1  ;;  %334 = vset.pattern.permute.xlu1 %v366_v3  ;;  %v311_v14 = vld [vmem:[%s475_s2] ss:$0 sm:$0xff]  ;;  %v368_v46 = vmov 683565275   ;;  %v369_v48 = vmov 2475754826  }
   0x4   :  { %335 = vset.pattern.permute.xlu0 %v366_v3  ;;  %21 = vperm.xlu1 %334, %v16_v2   ;;  %v405_v5 = vand.u32 127, %v18_v4  ;;  %v370_v51 = vmov 2131351028   ;;  %v371_v54 = vmov 2102212464   ;;  %s374_s2 = smov [#allocation2]  }
   0x5   :  { %v372_v57 = vmov 920167782   ;;  %v373_v60 = vmov 1326507024   ;;  %s303_s16 = sshll.u32 %s374_s2, 4  ;;  %s304_s16 = int_to_ptr.vmem [resolvable:$true] %s303_s16 }
   0x6   :  { %s342_s17 = scalar_lea.vmem %s304_s16, 128  ;;  %p347_p1 = scmp.lt.s32.totalorder %s304_s16, %s304_s16 }
   0x7   :  { %p343_p0 = scmp.ne.s32.totalorder %s304_s16, %s342_s17  ;;  %p348_p2 = scmp.lt.s32.totalorder %s342_s17, %s342_s17 }
   0x9   :  { %p349_p3 = por %p348_p2, %p347_p1 }
   0xb   :  { %p350_p4 = pnand %p349_p3, %p343_p0 }
  0x83   :  { %v410_v11 = vpop.permute.xlu1 %21 }
  0x84   :  { %vm23_vm2 = vcmp.eq.s32.totalorder %v405_v5, %v410_v11 }
  0x85   :  { %v24_v12 = vsel %vm23_vm2, %v398_v0, 0.0  ;;  %v35_v15 = vsel %vm23_vm2, %v311_v14, 0.0 }
  0x86   :  { %v26_v13 = vsel %vm25_vm0, %v24_v12, 0.0  ;;  %v36_v16 = vsel %vm25_vm0, %v35_v15, 0.0 }
  0x90   :  { %v41_v6 = vpop.xlane.xlu0 %40 }
  0x91   :  { %vm42_vm1 = vcmp.eq.f32.partialorder %v398_v0, %v41_v6 }
  0x92   :  { %v43_v7 = vsel %vm42_vm1, %v405_v5, 16 }
  0x93   :  { %v44_v8 = vsel %vm25_vm0, %v43_v7, 2147483647 }
  0x94   :  { %v46_v9 = vshra.s32 %v44_v8, 16  ;;  %v45_v17 = vand.u32 65535, %v44_v8 }
  0x96   :  { %v48_v10 = vcvt.s32.f32 %v46_v9  ;;  %v47_v19 = vcvt.s32.f32 %v45_v17 }
  0x98   :  { %49 = vmin.xlane.f32.xlu0 %v48_v10 }
  0x9c   :  { %27 = vadd.xlane.f32.xlu0 %v26_v13 }
  0xa0   :  { %37 = vadd.xlane.f32.xlu0 %v36_v16 }
 0x125   :  { %v50_v18 = vpop.xlane.xlu0 %49 }
 0x126   :  { %vm51_vm3 = vcmp.eq.f32.partialorder %v48_v10, %v50_v18  ;;  %v56_v21 = vcvt.f32.s32 %v50_v18 }
 0x127   :  { %v52_v20 = vsel %vm51_vm3, %v47_v19, inf }
 0x128   :  { %53 = vmin.xlane.f32.xlu1 %v52_v20  ;;  %v57_v23 = vshll.u32 %v56_v21, 16 }
 0x129   :  { %v426_v26 = vpop.xlane.xlu0 %27 }
 0x12a   :  { %v63_v29 = vsub.f32 1.0, %v426_v26 }
 0x12d   :  { %v38_v34 = vpop.xlane.xlu0 %37 }
 0x1b5   :  { %v54_v22 = vpop.xlane.xlu1 %53 }
 0x1b6   :  { %v55_v24 = vcvt.f32.s32 %v54_v22 }
 0x1b8   :  { %v58_v25 = vadd.s32 %v57_v23, %v55_v24 }
 0x1ba   :  { %vm59_vm4 = vcmp.ne.s32.totalorder %v58_v25, %v16_v2 }
 0x1bb   :  { %v312_v28 = vsel %vm59_vm4, 1.0, %v367_v27 }
 0x1bc   :  { %v62_v30 = vmul.f32 0.5, %v312_v28 }
 0x1be   :  { %v64_v31 = vmul.f32 %v63_v29, %v62_v30 }
 0x1c0   :  { %v65_v32 = vmul.f32 0.5, %v64_v31 }
 0x1c2   :  { %v66_v33 = vadd.f32 1.0, %v65_v32 }
 0x1c4   :  { %v431_v35 = vmul.f32 %v66_v33, %v38_v34 }
 0x1c6   :  { %v81_v36 = vand.u32 2139095040, %v431_v35  ;;  %v78_v40 = vand.u32 2147483647, %v431_v35  ;;  %vm80_vm12 = vcmp.lt.s32.totalorder %v431_v35, 0 }
 0x1c8   :  { %v82_v37 = vshrl.u32 %v81_v36, 23  ;;  %v85_v43 = vand.u32 8388607, %v78_v40  ;;  %vm79_vm13 = vcmp.le.f32.partialorder %v78_v40, 0.7853982 }
 0x1ca   :  { %v313_v38 = vadd.s32 4294967169, %v82_v37  ;;  %v86_v62 = vor.u32 8388608, %v85_v43 }
 0x1cc   :  { %v88_v39 = vadd.s32 1, %v313_v38  ;;  %v126_v15 = vshll.u32 %v86_v62, 8 }
 0x1ce   :  { %vm89_vm5 = vcmp.gt.s32.totalorder %v88_v39, 0 }
 0x1cf   :  { %v90_v41 = vsel %vm89_vm5, %v88_v39, 0 }
 0x1d0   :  { %v92_v42 = vand.u32 31, %v90_v41  ;;  %v91_v45 = vshrl.u32 %v90_v41, 5  ;;  %v68_v41 = vadd.f32 1.0, %v426_v26 }
 0x1d2   :  { %v93_v44 = vsub.s32 32, %v92_v42  ;;  %v95_v47 = vshll.u32 %v368_v46, %v92_v42  ;;  %v98_v49 = vshll.u32 %v369_v48, %v92_v42  ;;  %v101_v53 = vshll.u32 %v370_v51, %v92_v42 }
 0x1d3   :  { %v104_v56 = vshll.u32 %v371_v54, %v92_v42  ;;  %v107_v59 = vshll.u32 %v372_v57, %v92_v42  ;;  %vm110_vm6 = vcmp.lt.s32.totalorder %v91_v45, 1  ;;  %vm113_vm7 = vcmp.lt.s32.totalorder %v91_v45, 4 }
 0x1d4   :  { %v96_v50 = vshrl.u32 %v369_v48, %v93_v44  ;;  %v99_v52 = vshrl.u32 %v370_v51, %v93_v44  ;;  %v102_v55 = vshrl.u32 %v371_v54, %v93_v44  ;;  %v105_v58 = vshrl.u32 %v372_v57, %v93_v44 }
 0x1d5   :  { %v108_v61 = vshrl.u32 %v373_v60, %v93_v44  ;;  %v94_v9 = vshrl.u32 %v368_v46, %v93_v44  ;;  %vm112_vm8 = vcmp.lt.s32.totalorder %v91_v45, 3  ;;  %vm111_vm9 = vcmp.lt.s32.totalorder %v91_v45, 2 }
 0x1d6   :  { %v97_v63 = vor.u32 %v96_v50, %v95_v47  ;;  %v100_v1 = vor.u32 %v99_v52, %v98_v49  ;;  %v103_v2 = vor.u32 %v102_v55, %v101_v53  ;;  %v106_v3 = vor.u32 %v105_v58, %v104_v56 }
 0x1d7   :  { %v109_v4 = vor.u32 %v108_v61, %v107_v59  ;;  %v69_v46 = vmul.f32 %v68_v41, %v63_v29 }
 0x1d8   :  { %v115_v6 = vsel %vm113_vm7, %v103_v2, 2102212464  ;;  %v118_v7 = vsel %vm110_vm6, %v97_v63, %v100_v1  ;;  %v122_v8 = vsel %vm110_vm6, %v100_v1, %v103_v2  ;;  %v119_v10 = vsel %vm113_vm7, %v106_v3, 920167782 }
 0x1d9   :  { %v123_v12 = vsel %vm113_vm7, %v109_v4, 1326507024  ;;  %v120_v13 = vsel %vm112_vm8, %v103_v2, %v119_v10  ;;  %v114_v16 = vsel %vm110_vm6, %v94_v9, %v97_v63  ;;  %v116_v17 = vsel %vm112_vm8, %v100_v1, %v115_v6 }
 0x1da   :  { %v124_v14 = vsel %vm112_vm8, %v106_v3, %v123_v12  ;;  %v121_v18 = vsel %vm111_vm9, %v118_v7, %v120_v13  ;;  %v117_v24 = vsel %vm111_vm9, %v114_v16, %v116_v17  ;;  %v70_v52 = vmax.f32 %v69_v46, 0.0 }
 0x1db   :  { %v125_v19 = vsel %vm111_vm9, %v122_v8, %v124_v14  ;;  %v440_v22 = vmul.u32.u64.low %v126_v15, %v121_v18  ;;  %v441_v23 = vmul.u32.u64.high %v126_v15, %v121_v18, %v440_v22  ;;  %v133_v27 = vmul.u32 %v126_v15, %v117_v24 }
 0x1dc   :  { %v437_v20 = vmul.u32.u64.low %v126_v15, %v125_v19  ;;  %v438_v21 = vmul.u32.u64.high %v126_v15, %v125_v19, %v437_v20  ;;  %336 = vrsqrt.f32 %v70_v52  ;;  %vm73_vm14 = vcmp.eq.f32.partialorder %v70_v52, inf }
 0x1dd   :  { %v136_v25 = vadd.s32 1, %v441_v23  ;;  %v76_v8 = vand.u32 2147483648, %v70_v52  ;;  %vm75_vm15 = vcmp.eq.f32.partialorder %v70_v52, 0.0  ;;  %vm170_vm8 = vweird.f32 %v431_v35 }
 0x1de   :  { %vm135_vm10 = vc.u32 %v438_v21, %v440_v22  ;;  %v134_v43 = vadd.s32 %v440_v22, %v438_v21  ;;  %v289_v24 = vmul.f32 30.0, %v398_v0 }
 0x1df   :  { %v137_v28 = vsel %vm135_vm10, %v136_v25, %v441_v23 }
 0x1e0   :  { %v138_v30 = vadd.s32 %v137_v28, %v133_v27 }
 0x1e2   :  { %v139_v31 = vadd.s32 536870912, %v138_v30 }
 0x1e4   :  { %v140_v32 = vshrl.u32 %v139_v31, 30 }
 0x1e6   :  { %v141_v33 = vshll.u32 %v140_v32, 30  ;;  %v164_v57 = vsub.s32 4, %v140_v32  ;;  %v337_v62 = vpop.eup %336 }
 0x1e7   :  { %v72_v1 = vmul.f32 %v337_v62, %v70_v52 }
 0x1e8   :  { %v142_v34 = vsub.s32 %v138_v30, %v141_v33  ;;  %v165_v29 = vsel %vm80_vm12, %v164_v57, %v140_v32 }
 0x1e9   :  { %v167_v61 = vsel %vm79_vm13, 0, %v165_v29  ;;  %v74_v7 = vsel %vm73_vm14, %v70_v52, %v72_v1 }
 0x1ea   :  { %v144_v36 = vsub.s32 0, %v142_v34  ;;  %v275_v63 = vadd.s32 3, %v167_v61  ;;  %v171_v2 = vand.u32 3, %v167_v61  ;;  %v77_v17 = vsel %vm75_vm15, %v76_v8, %v74_v7 }
 0x1ec   :  { %v314_v37 = vmin.u32 %v144_v36, %v142_v34  ;;  %v276_v3 = vand.u32 3, %v275_v63  ;;  %vm176_vm1 = vcmp.eq.s32.totalorder %v171_v2, 2  ;;  %vm173_vm4 = vcmp.eq.s32.totalorder %v171_v2, 0 }
 0x1ed   :  { %vm172_vm6 = vcmp.lt.s32.totalorder %v171_v2, 2 }
 0x1ee   :  { %v146_v38 = vclz %v314_v37  ;;  %vm281_vm3 = vcmp.eq.s32.totalorder %v276_v3, 2  ;;  %vm278_vm5 = vcmp.eq.s32.totalorder %v276_v3, 0  ;;  %vm277_vm7 = vcmp.lt.s32.totalorder %v276_v3, 2 }
 0x1f0   :  { %v315_v39 = vadd.s32 4294967294, %v146_v38 }
 0x1f2   :  { %vm316_vm11 = vcmp.lt.s32.totalorder %v315_v39, 0 }
 0x1f3   :  { %v149_v42 = vsel %vm316_vm11, 0, %v315_v39 }
 0x1f4   :  { %v150_v44 = vsub.s32 32, %v149_v42  ;;  %v154_v45 = vsub.s32 4294967266, %v149_v42  ;;  %v151_v47 = vshll.u32 %v142_v34, %v149_v42 }
 0x1f6   :  { %v152_v48 = vshrl.u32 %v134_v43, %v150_v44  ;;  %v155_v49 = vadd.s32 127, %v154_v45 }
 0x1f8   :  { %v153_v50 = vor.u32 %v152_v48, %v151_v47  ;;  %v156_v51 = vshll.u32 %v155_v49, 23 }
 0x1fa   :  { %v157_v53 = vor.u32 4788187, %v156_v51  ;;  %v160_v55 = vcvt.s32.f32 %v153_v50 }
 0x1fc   :  { %v158_v54 = vand.u32 2147483647, %v157_v53 }
 0x1fe   :  { %v161_v56 = vmul.f32 %v160_v55, %v158_v54 }
 0x200   :  { %v162_v58 = vxor.u32 2147483648, %v161_v56 }
 0x202   :  { %v163_v59 = vsel %vm80_vm12, %v162_v58, %v161_v56 }
 0x203   :  { %v166_v60 = vsel %vm79_vm13, %v431_v35, %v163_v59 }
 0x204   :  { %338 = vcosq.f32 %v166_v60 }
 0x205   :  { %340 = vsinq.f32 %v166_v60 }
 0x20e   :  { %v339_v4 = vpop.eup %338 }
 0x20f   :  { %v341_v6 = vpop.eup %340  ;;  %v177_v9 = vxor.u32 2147483648, %v339_v4 }
 0x210   :  { %v174_v40 = vxor.u32 2147483648, %v341_v6 }
 0x211   :  { %v178_v10 = vsel %vm176_vm1, %v177_v9, %v341_v6  ;;  %v283_v12 = vsel %vm281_vm3, %v177_v9, %v341_v6 }
 0x212   :  { %v175_v13 = vsel %vm173_vm4, %v339_v4, %v174_v40  ;;  %v280_v14 = vsel %vm278_vm5, %v339_v4, %v174_v40 }
 0x213   :  { %v179_v15 = vsel %vm172_vm6, %v175_v13, %v178_v10  ;;  %v284_v16 = vsel %vm277_vm7, %v280_v14, %v283_v12 }
 0x214   :  { %v180_v18 = vsel %vm170_vm8, nan, %v179_v15  ;;  %v285_v19 = vsel %vm170_vm8, nan, %v284_v16 }
 0x215   :  { %v181_v20 = vmul.f32 %v180_v18, %v426_v26  ;;  %v286_v21 = vmul.f32 %v285_v19, %v77_v17 }
 0x217   :  { %v287_v22 = vsub.f32 %v181_v20, %v286_v21 }
 0x219   :  { %v288_v23 = vmul.f32 30.0, %v287_v22 }
 0x21b   :  { %292 = vperm.xlu0 %335, %v288_v23  }
 0x29a   :  { %v293_v25 = vpop.permute.xlu0 %292 }
 0x29b   :  { %v295_v35 = vsel %vm23_vm2, %v293_v25, %v289_v24 }
 0x29c   :  { %296 = vst.msk [vmem:[#allocation2] sm:$0xff] %vm25_vm0, %v295_v35 }
 0x29d   :  { %353 = shalt.err (!%p350_p4)
}
 0x29e   :  { %s354_s20 = scalar_lea.hbm %s476_s3, 128 }
 0x29f   :  { %p355_p5 = scmp.ne.s32.totalorder %s476_s3, %s354_s20  ;;  %p358_p6 = scmp.lt.u32.totalorder %s354_s20, %s476_s3 }
 0x2a1   :  { %p360_p7 = pnand %p358_p6, %p355_p5 }
 0x2a3   :  { %363 = shalt.err (!%p360_p7)
}
 0x2a4   :  { %306 = dma.vmem_to_hbm [thread:$0]  %s304_s16, 128, %s476_s3, [#allocation3]  }
 0x2a5   :  { %364 = dma.done.wait [#allocation3], 128  }
 0x2a6   :  { %365 = vsyncadd [#allocation3], 4294967168 }
 0x2a7   :  { %310 = vsyncpa [#allocation3], 1 }

</bundles_post_ra>
